<compile_context>
chip_gen: v7x
topology: tpu7x:2x2x1
jax: 0.10.0
libtpu: 0.0.40
codegen_flags: <defaults>
</compile_context>

<pallas_src>
import jax
import jax.numpy as jnp
from jax.experimental import pallas as pl
from jax.experimental.pallas import tpu as pltpu

IN_DIM = 2
HID_DIM = 50
OUT_DIM = 2


def odefunc_kernel(yT_ref, w1_ref, b1_ref, w2_ref, b2_ref, out_ref):
    # yT_ref : (2, TM)     batch on lanes
    # w1_ref : (50, 2)     b1_ref : (50, 1)
    # w2_ref : (50, 2)     b2_ref : (2, 1)
    # out_ref: (2, TM)
    y3 = yT_ref[...]
    y3 = y3 * y3 * y3                        # (2, TM), elementwise cube (VPU)
    y0_3 = y3[0:1, :]                        # (1, TM)
    y1_3 = y3[1:2, :]                        # (1, TM)

    # First linear (K=2) as two rank-1 VPU broadcast FMAs, then tanh (EUP).
    h_pre = (w1_ref[:, 0:1] * y0_3           # (50,1)*(1,TM) -> (50,TM)
             + w1_ref[:, 1:2] * y1_3
             + b1_ref[...])                  # (50,1) broadcast over lanes
    h = jnp.tanh(h_pre)                      # (50, TM), lane-dense

    # Second linear (50 -> 2): broadcast multiply + sublane (XLU) reductions.
    s0 = jnp.sum(w2_ref[:, 0:1] * h, axis=0, keepdims=True)   # (1, TM)
    s1 = jnp.sum(w2_ref[:, 1:2] * h, axis=0, keepdims=True)   # (1, TM)
    out = jnp.concatenate([s0, s1], axis=0) + b2_ref[...]     # (2, TM)

    out_ref[...] = out.astype(out_ref.dtype)                  # single store


def odefunc_forward(t, y, w1, b1, w2, b2, *, tm=None):
    """Pallas implementation of ODEFunc.forward(t, y). `t` is unused.

    y: (N, 2) row-major, any N (padded internally). Returns (N, 2).
    """
    del t  # reference module ignores t
    n, d = y.shape
    assert d == IN_DIM

    if tm is None:
        # >=128 lanes (full lane tile), big enough to amortize the ~0.35us
        # per-grid-step overhead, >=2 steps for n >= 256 (both v7x cores),
        # capped so the (50, tm) f32 hidden tile stays well under 1 MiB VMEM.
        tm = min(max(pl.next_power_of_2(pl.cdiv(n, 2)), 128), 4096)
    n_pad = pl.cdiv(n, tm) * tm

    # Batch on the last (lane) axis; pad to a tile multiple (no caller
    # divisibility constraint). Wrapper-side transpose is layout plumbing so
    # the kernel's loads/stores stay lane-dense and unmasked.
    yT = y.T
    if n_pad != n:
        yT = jnp.pad(yT, ((0, 0), (0, n_pad - n)))

    grid = (n_pad // tm,)
    outT = pl.pallas_call(
        odefunc_kernel,
        out_shape=jax.ShapeDtypeStruct((OUT_DIM, n_pad), y.dtype),
        grid_spec=pltpu.PrefetchScalarGridSpec(
            num_scalar_prefetch=0,
            grid=grid,
            in_specs=[
                pl.BlockSpec((IN_DIM, tm), lambda i: (0, i)),        # yT tile
                pl.BlockSpec((HID_DIM, IN_DIM), lambda i: (0, 0)),   # W1 (resident)
                pl.BlockSpec((HID_DIM, 1), lambda i: (0, 0)),        # b1
                pl.BlockSpec((HID_DIM, OUT_DIM), lambda i: (0, 0)),  # W2
                pl.BlockSpec((OUT_DIM, 1), lambda i: (0, 0)),        # b2
            ],
            out_specs=pl.BlockSpec((OUT_DIM, tm), lambda i: (0, i)),
        ),
        compiler_params=pltpu.CompilerParams(
            dimension_semantics=("parallel",),
        ),
    )(yT, w1, b1, w2, b2)

    return outT[:, :n].T


def init_params(key):
    """Deterministic init mirroring the torch module:
    weights ~ Normal(0, 0.1), biases = 0. Layout documented at top of file."""
    k1, k2 = jax.random.split(key)
    w1 = 0.1 * jax.random.normal(k1, (HID_DIM, IN_DIM), dtype=jnp.float32)
    b1 = jnp.zeros((HID_DIM, 1), dtype=jnp.float32)
    w2 = 0.1 * jax.random.normal(k2, (HID_DIM, OUT_DIM), dtype=jnp.float32)
    b2 = jnp.zeros((OUT_DIM, 1), dtype=jnp.float32)
    return w1, b1, w2, b2


def odefunc_ref(t, y, w1, b1, w2, b2):
    del t
    y3 = y ** 3
    h = jnp.tanh(y3 @ w1.T + b1[:, 0])   # (N, 50)
    return h @ w2 + b2[:, 0]             # (N, 2)


if __name__ == "__main__":
    # TODO(synk): inside an actual ODE integrator loop with small N, fuse
    # multiple f(t, y) evaluations per pallas_call (weights stay resident) —
    # a single tiny eval is launch-overhead dominated no matter how it's tiled.
    key = jax.random.PRNGKey(0)
    kp, ky = jax.random.split(key)

    w1, b1, w2, b2 = init_params(kp)

    N = 256  # batch of ODE states, each state has 2 components
    y = jax.random.normal(ky, (N, IN_DIM), dtype=jnp.float32)
    t = jnp.float32(0.0)  # unused, kept for interface parity

    out = odefunc_forward(t, y, w1, b1, w2, b2)
    out = jax.block_until_ready(out)

    ref = odefunc_ref(t, y, w1, b1, w2, b2)
    assert out.shape == (N, OUT_DIM)
    assert jnp.allclose(out, ref, atol=1e-5, rtol=1e-5), "mismatch vs reference"

    # Also exercise a non-tile-multiple batch (padded tail path).
    y2 = jax.random.normal(jax.random.PRNGKey(1), (100, IN_DIM), dtype=jnp.float32)
    out2 = jax.block_until_ready(odefunc_forward(t, y2, w1, b1, w2, b2))
    ref2 = odefunc_ref(t, y2, w1, b1, w2, b2)
    assert out2.shape == (100, OUT_DIM)
    assert jnp.allclose(out2, ref2, atol=1e-5, rtol=1e-5), "mismatch (padded tail)"

    print("KERNEL_OK")
</pallas_src>

<mosaic_0001>
module attributes {stable_mosaic.version = 11 : i64} {
  func.func @odefunc_kernel(%arg0: i32, %arg1: memref<2x128xf32, #tpu.memory_space<vmem>>, %arg2: memref<50x2xf32, #tpu.memory_space<vmem>>, %arg3: memref<50x1xf32, #tpu.memory_space<vmem>>, %arg4: memref<50x2xf32, #tpu.memory_space<vmem>>, %arg5: memref<2x1xf32, #tpu.memory_space<vmem>>, %arg6: memref<2x128xf32, #tpu.memory_space<vmem>>) attributes {dimension_semantics = [#tpu.dimension_semantics<parallel>], iteration_bounds = array<i64: 2>, scalar_prefetch = 0 : i64, scratch_operands = 0 : i64, tpu.core_type = #tpu.core_type<tc>, window_params = [{transform_indices = @transform_0, window_bounds = array<i64: 2, 128>}, {pipeline_mode = #tpu.pipeline_mode<synchronous>, transform_indices = @transform_1, window_bounds = array<i64: 50, 2>}, {pipeline_mode = #tpu.pipeline_mode<synchronous>, transform_indices = @transform_2, window_bounds = array<i64: 50, 1>}, {pipeline_mode = #tpu.pipeline_mode<synchronous>, transform_indices = @transform_3, window_bounds = array<i64: 50, 2>}, {pipeline_mode = #tpu.pipeline_mode<synchronous>, transform_indices = @transform_4, window_bounds = array<i64: 2, 1>}, {transform_indices = @transform_5, window_bounds = array<i64: 2, 128>}]} {
    %c0 = arith.constant 0 : index
    %c0_0 = arith.constant 0 : index
    %0 = vector.load %arg1[%c0, %c0_0] : memref<2x128xf32, #tpu.memory_space<vmem>>, vector<2x128xf32>
    %1 = arith.mulf %0, %0 : vector<2x128xf32>
    %2 = arith.mulf %1, %0 : vector<2x128xf32>
    %3 = vector.extract_strided_slice %2 {offsets = [0, 0], sizes = [1, 128], strides = [1, 1]} : vector<2x128xf32> to vector<1x128xf32>
    %4 = vector.extract_strided_slice %2 {offsets = [1, 0], sizes = [1, 128], strides = [1, 1]} : vector<2x128xf32> to vector<1x128xf32>
    %c0_1 = arith.constant 0 : index
    %c0_2 = arith.constant 0 : index
    %5 = vector.load %arg2[%c0_1, %c0_2] : memref<50x2xf32, #tpu.memory_space<vmem>>, vector<50x1xf32>
    %6 = vector.broadcast %5 : vector<50x1xf32> to vector<50x128xf32>
    %7 = vector.broadcast %3 : vector<1x128xf32> to vector<50x128xf32>
    %8 = arith.mulf %6, %7 : vector<50x128xf32>
    %c0_3 = arith.constant 0 : index
    %c1 = arith.constant 1 : index
    %9 = vector.load %arg2[%c0_3, %c1] : memref<50x2xf32, #tpu.memory_space<vmem>>, vector<50x1xf32>
    %10 = vector.broadcast %9 : vector<50x1xf32> to vector<50x128xf32>
    %11 = vector.broadcast %4 : vector<1x128xf32> to vector<50x128xf32>
    %12 = arith.mulf %10, %11 : vector<50x128xf32>
    %13 = arith.addf %8, %12 : vector<50x128xf32>
    %c0_4 = arith.constant 0 : index
    %c0_5 = arith.constant 0 : index
    %14 = vector.load %arg3[%c0_4, %c0_5] : memref<50x1xf32, #tpu.memory_space<vmem>>, vector<50x1xf32>
    %15 = vector.broadcast %14 : vector<50x1xf32> to vector<50x128xf32>
    %16 = arith.addf %13, %15 : vector<50x128xf32>
    %17 = math.tanh %16 : vector<50x128xf32>
    %c0_6 = arith.constant 0 : index
    %c0_7 = arith.constant 0 : index
    %18 = vector.load %arg4[%c0_6, %c0_7] : memref<50x2xf32, #tpu.memory_space<vmem>>, vector<50x1xf32>
    %19 = vector.broadcast %18 : vector<50x1xf32> to vector<50x128xf32>
    %20 = arith.mulf %19, %17 : vector<50x128xf32>
    %cst = arith.constant dense<0.000000e+00> : vector<128xf32>
    %21 = vector.multi_reduction <add>, %20, %cst [0] : vector<50x128xf32> to vector<128xf32>
    %22 = vector.shape_cast %21 : vector<128xf32> to vector<1x128xf32>
    %c0_8 = arith.constant 0 : index
    %c1_9 = arith.constant 1 : index
    %23 = vector.load %arg4[%c0_8, %c1_9] : memref<50x2xf32, #tpu.memory_space<vmem>>, vector<50x1xf32>
    %24 = vector.broadcast %23 : vector<50x1xf32> to vector<50x128xf32>
    %25 = arith.mulf %24, %17 : vector<50x128xf32>
    %cst_10 = arith.constant dense<0.000000e+00> : vector<128xf32>
    %26 = vector.multi_reduction <add>, %25, %cst_10 [0] : vector<50x128xf32> to vector<128xf32>
    %27 = vector.shape_cast %26 : vector<128xf32> to vector<1x128xf32>
    %28 = tpu.concatenate %22, %27 in 0 : vector<1x128xf32>, vector<1x128xf32> -> vector<2x128xf32>
    %c0_11 = arith.constant 0 : index
    %c0_12 = arith.constant 0 : index
    %29 = vector.load %arg5[%c0_11, %c0_12] : memref<2x1xf32, #tpu.memory_space<vmem>>, vector<2x1xf32>
    %30 = vector.broadcast %29 : vector<2x1xf32> to vector<2x128xf32>
    %31 = arith.addf %28, %30 : vector<2x128xf32>
    %c0_13 = arith.constant 0 : index
    %c0_14 = arith.constant 0 : index
    %32 = vector.load %arg6[%c0_13, %c0_14] : memref<2x128xf32, #tpu.memory_space<vmem>>, vector<2x128xf32>
    tpu.vector_store %arg6[%c0_13, %c0_14], %31 {strides = array<i32>} : memref<2x128xf32, #tpu.memory_space<vmem>>, vector<2x128xf32>,
    return
  }
  func.func @transform_0(%arg0: i32) -> (i32, i32) {
    %c0_i32 = arith.constant 0 : i32
    %c0_i32_0 = arith.constant 0 : i32
    return %c0_i32, %arg0 : i32, i32
  }
  func.func @transform_1(%arg0: i32) -> (i32, i32) {
    %c0_i32 = arith.constant 0 : i32
    %c0_i32_0 = arith.constant 0 : i32
    %c0_i32_1 = arith.constant 0 : i32
    return %c0_i32, %c0_i32_0 : i32, i32
  }
  func.func @transform_2(%arg0: i32) -> (i32, i32) {
    %c0_i32 = arith.constant 0 : i32
    %c0_i32_0 = arith.constant 0 : i32
    %c0_i32_1 = arith.constant 0 : i32
    return %c0_i32, %c0_i32_0 : i32, i32
  }
  func.func @transform_3(%arg0: i32) -> (i32, i32) {
    %c0_i32 = arith.constant 0 : i32
    %c0_i32_0 = arith.constant 0 : i32
    %c0_i32_1 = arith.constant 0 : i32
    return %c0_i32, %c0_i32_0 : i32, i32
  }
  func.func @transform_4(%arg0: i32) -> (i32, i32) {
    %c0_i32 = arith.constant 0 : i32
    %c0_i32_0 = arith.constant 0 : i32
    %c0_i32_1 = arith.constant 0 : i32
    return %c0_i32, %c0_i32_0 : i32, i32
  }
  func.func @transform_5(%arg0: i32) -> (i32, i32) {
    %c0_i32 = arith.constant 0 : i32
    %c0_i32_0 = arith.constant 0 : i32
    return %c0_i32, %arg0 : i32, i32
  }
}

</mosaic_0001>

<bundles_post_ra>
// kernel: tpu_custom_call.1
= control target key start
LH: loop header
LB: loop body
LE: loop exit
PB: predicated region body
PF: predicated region fallthrough
CT: control target
= control target key end

     0   :  { %10 = vsyncpa [#allocation3], 0  ;;  %s932_s0 = inlined_call_operand.vmem [shape: f32[2,256], index: 0, kind: input, shape index: {}]   ;;  %s933_s1 = inlined_call_operand.vmem [shape: f32[50,2], index: 1, kind: input, shape index: {}]   ;;  %s934_s2 = inlined_call_operand.vmem [shape: f32[50,1], index: 2, kind: input, shape index: {}]   ;;  %s935_s3 = inlined_call_operand.vmem [shape: f32[50,2], index: 3, kind: input, shape index: {}]   ;;  %s936_s4 = inlined_call_operand.vmem [shape: f32[2,1], index: 4, kind: input, shape index: {}]   ;;  %s937_s5 = inlined_call_operand.hbm [shape: f32[2,256], index: 5, kind: output, shape index: {}]  }
   0x1   :  { %12 = vsyncpa [#allocation3 + $0x1], 0  ;;  %s749_s18 = smov 0   ;;  %s751_s19 = smov 0  }
   0x2   :  { %s753_s20 = smov 0   ;;  %s755_s21 = smov 0  }
   0x3 LB: > { %s770_s22 = sadd.s32 4294967295, %s714_s21   ;;  %s572_s23 = sadd.s32 4294967294, %s714_s21   ;;  %s714_s21 = sphi %s755_s21, %s943_s21   ;;  %s710_s20 = sphi %s753_s20, %s942_s20   ;;  %s706_s19 = sphi %s751_s19, %s941_s19   ;;  %s702_s18 = sphi %s749_s18, %s940_s18  }
   0x4   : > { %s774_s24 = sadd.s32 1, %s714_s21   ;;  %s135_s25 = sadd.s32 1, %s710_s20 }
   0x5   : > { %s132_s26 = ssub.s32 %s714_s21, %s774_s24  ;;  %p145_p0 = scmp.ne.s32.totalorder %s710_s20, %s706_s19 }
   0x6   : > { %p133_p1 = scmp.eq.s32.totalorder %s132_s26, 0  ;;  %p146_p2 = scmp.eq.s32.totalorder %s770_s22, 1 }
   0x7   : > { %p151_p3 = scmp.ne.s32.totalorder %s706_s19, %s702_s18  ;;  %p152_p4 = scmp.eq.s32.totalorder %s572_s23, 1 }
   0x8   : > { %s785_s27 = scalar_select %p133_p1, %s710_s20, %s135_s25  }
   0x9   : > { %p787_p5 = por %p146_p2, %p145_p0  ;;  %p791_p6 = por %p152_p4, %p151_p3 }
   0xa   : > { %p575_p7 = scmp.ge.s32.totalorder %s714_s21, 1  ;;  %p189_p8 = scmp.lt.s32.totalorder %s714_s21, 3 }
   0xc   : > { %p190_p9 = pnand %p575_p7, %p189_p8 }
   0xd   : > { %v225_v0 = vld [vmem:[%s933_s1 + $0x10] sm:$0xff] (!%p190_p9)  ;;  %v224_v1 = vld [vmem:[%s933_s1 + $0x8] sm:$0xff] (!%p190_p9)  ;;  %v716_v2 = vmov (!%p190_p9), 1   ;;  %v717_v3 = vmov (!%p190_p9), 0   ;;  %v226_v4 = vld [vmem:[%s933_s1 + $0x18] sm:$0xff] (!%p190_p9)  ;;  %p216_p10 = scmp.lt.s32.totalorder (!%p190_p9), %s770_s22, 1  ;;  %v265_v38 = vlaneseq (!%p190_p9) }
   0xe   : > { %193 = sbr.rel (%p190_p9) target bundleno = 262 (0x106), region = 40  ;;  %625 = vset.pattern.permute.xlu0 (!%p190_p9), %v716_v2  ;;  %623 = vset.pattern.permute.xlu1 (!%p190_p9), %v717_v3  ;;  %v223_v5 = vld [vmem:[%s933_s1] sm:$0xff] (!%p190_p9)  ;;  %v228_v6 = vld [vmem:[%s933_s1 + $0x28] sm:$0xff] (!%p190_p9)  ;;  %v229_v8 = vld [vmem:[%s933_s1 + $0x30] sm:$0x3] (!%p190_p9)  ;;  %vm432_vm0 = vcmask (!%p190_p9), 1041408  }
   0xf   : > { %242 = vperm.xlu1 (!%p190_p9), %623, %v225_v0   ;;  %281 = vperm.xlu0 (!%p190_p9), %625, %v224_v1   ;;  %v227_v7 = vld [vmem:[%s933_s1 + $0x20] sm:$0xff] (!%p190_p9)  ;;  %v324_v10 = vld [vmem:[%s934_s2 + $0x10] sm:$0xff] (!%p190_p9)  ;;  %v323_v11 = vld [vmem:[%s934_s2 + $0x8] sm:$0xff] (!%p190_p9)  ;;  %v266_v42 = vshrl.u32 (!%p190_p9), %v265_v38, 7  ;;  %s213_s6 = sand.u32 (!%p190_p9), 1, %s706_s19   ;;  %vm489_vm1 = vcmask (!%p190_p9), 1040384  }
  0x10   : > { %v322_v9 = vld [vmem:[%s934_s2] sm:$0xff] (!%p190_p9)  ;;  %v325_v12 = vld [vmem:[%s934_s2 + $0x18] sm:$0xff] (!%p190_p9)  ;;  %v328_v14 = vld [vmem:[%s934_s2 + $0x30] sm:$0x3] (!%p190_p9)  ;;  %s576_s7 = sshll.u32 (!%p190_p9), %s213_s6, 1  ;;  %s579_s8 = sshll.u32 (!%p190_p9), %s770_s22, 5 }
  0x11   : > { %v326_v13 = vld [vmem:[%s934_s2 + $0x20] sm:$0xff] (!%p190_p9)  ;;  %v379_v15 = vld [vmem:[%s935_s3 + $0x8] sm:$0xff] (!%p190_p9)  ;;  %v381_v17 = vld [vmem:[%s935_s3 + $0x18] sm:$0xff] (!%p190_p9)  ;;  %v306_v45 = vsub.s32 (!%p190_p9), 1, %v266_v42  ;;  %v267_v47 = vsub.s32 (!%p190_p9), 0, %v266_v42  ;;  %s215_s9 = scalar_lea.vmem (!%p190_p9), [#allocation2], %s576_s7  ;;  %s890_s13 = scalar_lea.hbm (!%p190_p9), %s937_s5, %s579_s8 }
  0x12   : > { %v327_v16 = vld [vmem:[%s934_s2 + $0x28] sm:$0xff] (!%p190_p9)  ;;  %v378_v18 = vld [vmem:[%s935_s3] sm:$0xff] (!%p190_p9)  ;;  %v380_v20 = vld [vmem:[%s935_s3 + $0x10] sm:$0xff] (!%p190_p9)  ;;  %s513_s10 = sshll.u32 (!%p190_p9), %s215_s9, 4  ;;  %s500_s14 = scalar_lea.sflag (!%p190_p9), [#allocation3], %s213_s6  ;;  %s892_s10 = int_to_ptr.vmem [resolvable:$true] %s513_s10 }
  0x13   : > { %247 = vperm.xlu1 (!%p190_p9), %623, %v226_v4   ;;  %626 = vset.pattern.permute.xlu0 (!%p190_p9), %v717_v3  ;;  %v382_v19 = vld [vmem:[%s935_s3 + $0x20] sm:$0xff] (!%p190_p9)  ;;  %v384_v21 = vld [vmem:[%s935_s3 + $0x30] sm:$0x3] (!%p190_p9)  ;;  %v383_v22 = vld [vmem:[%s935_s3 + $0x28] sm:$0xff] (!%p190_p9)  ;;  %s652_s15 = scalar_lea.vmem (!%p190_p9), %s892_s10, 32 }
  0x14   : > { %232 = vperm.xlu0 (!%p190_p9), %626, %v223_v5   ;;  %v491_v23 = vld [vmem:[%s936_s4] sm:$0x3] (!%p190_p9)  ;;  %p653_p11 = scmp.ne.s32.totalorder (!%p190_p9), %s892_s10, %s652_s15 }
  0x15   : > { %s217_s17 = scalar_select %p216_p10, %s770_s22, 1 }
  0x16   : > { %p654_p12 = pnand %p653_p11, %p787_p5  ;;  %s718_s22 = smov [#allocation2]  }
  0x17   : > { %257 = vperm.xlu1 %623, %v228_v6   ;;  %s577_s23 = sshll.u32 %s217_s17, 1  ;;  %s656_s16 = sshll.u32 %s718_s22, 4  ;;  %s657_s16 = int_to_ptr.vmem [resolvable:$false] %s656_s16 }
  0x18   : > { %237 = vperm.xlu0 %626, %v224_v1   ;;  %s219_s30 = scalar_lea.vmem %s932_s0, %s577_s23  ;;  %p655_p13 = pneg %p654_p12 }
  0x19   : > { %v220_v39 = vld [vmem:[%s219_s30] sm:$0x3]  ;;  %s658_s17 = scalar_lea.vmem %s657_s16, 64  ;;  %p659_p0 = scmp.lt.s32.totalorder %s892_s10, %s657_s16 }
  0x1a   : > { %v221_v43 = vmul.f32 %v220_v39, %v220_v39  ;;  %p660_p1 = scmp.lt.s32.totalorder %s658_s17, %s652_s15 }
  0x1b   : > { %624 = vset.pattern.permute.xlu1 %v716_v2 }
  0x1c   : > { %252 = vperm.xlu0 %626, %v227_v7   ;;  %277 = vperm.xlu1 %624, %v223_v5   ;;  %v222_v48 = vmul.f32 %v221_v43, %v220_v39  ;;  %p661_p2 = por %p660_p1, %p659_p0 }
  0x1e   : > { %v307_v50 = vrot.slane %v222_v48, %v306_v45  ;;  %v268_v51 = vrot.slane %v222_v48, %v267_v47  ;;  %p662_p3 = pnand %p661_p2, %p655_p13 }
  0x20   : > { %262 = vperm.xlu0 %626, %v229_v8   ;;  %285 = vperm.xlu1 %624, %v225_v0  }
  0x24   : > { %331 = vperm.xlu0 %626, %v322_v9   ;;  %289 = vperm.xlu1 %624, %v226_v4  }
  0x28   : > { %341 = vperm.xlu0 %626, %v324_v10   ;;  %627 = vset.pattern.permute.xlu1 %v717_v3 }
  0x29   : > { %336 = vperm.xlu1 %627, %v323_v11  }
  0x2c   : > { %346 = vperm.xlu0 %626, %v325_v12  }
  0x2d   : > { %628 = vset.pattern.permute.xlu1 %v716_v2 }
  0x2e   : > { %293 = vperm.xlu1 %628, %v227_v7  }
  0x30   : > { %351 = vperm.xlu0 %626, %v326_v13  }
  0x32   : > { %297 = vperm.xlu1 %628, %v228_v6  }
  0x34   : > { %361 = vperm.xlu0 %626, %v328_v14  }
  0x36   : > { %301 = vperm.xlu1 %628, %v229_v8  }
  0x38   : > { %392 = vperm.xlu0 %626, %v379_v15  }
  0x3a   : > { %629 = vset.pattern.permute.xlu1 %v717_v3 }
  0x3b   : > { %356 = vperm.xlu1 %629, %v327_v16  }
  0x3c   : > { %402 = vperm.xlu0 %626, %v381_v17  }
  0x3f   : > { %387 = vperm.xlu1 %629, %v378_v18  }
  0x40   : > { %633 = vset.pattern.permute.xlu0 %v716_v2 }
  0x41   : > { %446 = vperm.xlu0 %633, %v379_v15  }
  0x43   : > { %630 = vset.pattern.permute.xlu1 %v716_v2 }
  0x44   : > { %442 = vperm.xlu1 %630, %v378_v18  }
  0x45   : > { %458 = vperm.xlu0 %633, %v382_v19  }
  0x48   : > { %631 = vset.pattern.permute.xlu1 %v717_v3 }
  0x49   : > { %636 = vset.pattern.permute.xlu0 %v717_v3  ;;  %397 = vperm.xlu1 %631, %v380_v20  }
  0x4a   : > { %417 = vperm.xlu0 %636, %v384_v21  }
  0x4d   : > { %632 = vset.pattern.permute.xlu1 %v716_v2 }
  0x4e   : > { %450 = vperm.xlu1 %632, %v380_v20  }
  0x52   : > { %454 = vperm.xlu1 %632, %v381_v17  }
  0x56   : > { %634 = vset.pattern.permute.xlu1 %v717_v3 }
  0x57   : > { %407 = vperm.xlu1 %634, %v382_v19  }
  0x5b   : > { %412 = vperm.xlu1 %634, %v383_v22  }
  0x5f   : > { %635 = vset.pattern.permute.xlu1 %v716_v2 }
  0x60   : > { %462 = vperm.xlu1 %635, %v383_v22  }
  0x64   : > { %466 = vperm.xlu1 %635, %v384_v21  }
  0x68   : > { %637 = vset.pattern.permute.xlu1 %v717_v3 }
  0x69   : > { %494 = vperm.xlu1 %637, %v491_v23  }
  0x8e   : > { %v243_v24 = vpop.permute.xlu1 %242  ;;  %v282_v25 = vpop.permute.xlu0 %281 }
  0x8f   : > { %v309_v53 = vmul.f32 %v307_v50, %v282_v25  ;;  %v271_v59 = vmul.f32 %v268_v51, %v243_v24 }
  0x92   : > { %v248_v26 = vpop.permute.xlu1 %247 }
  0x93   : > { %v233_v27 = vpop.permute.xlu0 %232  ;;  %v272_v7 = vmul.f32 %v268_v51, %v248_v26 }
  0x94   : > { %v269_v54 = vmul.f32 %v268_v51, %v233_v27 }
  0x96   : > { %v258_v28 = vpop.permute.xlu1 %257 }
  0x97   : > { %v238_v29 = vpop.permute.xlu0 %237  ;;  %v274_v17 = vmul.f32 %v268_v51, %v258_v28 }
  0x98   : > { %v270_v55 = vmul.f32 %v268_v51, %v238_v29 }
  0x9a   : > { %v316_v61 = vadd.f32 %v309_v53, %v270_v55 }
  0x9b   : > { %v253_v30 = vpop.permute.xlu0 %252  ;;  %v278_v31 = vpop.permute.xlu1 %277 }
  0x9c   : > { %v308_v56 = vmul.f32 %v307_v50, %v278_v31  ;;  %v273_v1 = vmul.f32 %v268_v51, %v253_v30 }
  0x9e   : > { %v315_v60 = vadd.f32 %v308_v56, %v269_v54 }
  0x9f   : > { %v263_v32 = vpop.permute.xlu0 %262  ;;  %v286_v33 = vpop.permute.xlu1 %285 }
  0xa0   : > { %v310_v58 = vmul.f32 %v307_v50, %v286_v33  ;;  %v275_v11 = vmul.f32 %v268_v51, %v263_v32 }
  0xa2   : > { %v317_v63 = vadd.f32 %v310_v58, %v271_v59 }
  0xa3   : > { %v332_v34 = vpop.permute.xlu0 %331  ;;  %v290_v35 = vpop.permute.xlu1 %289 }
  0xa4   : > { %v364_v2 = vadd.f32 %v332_v34, %v315_v60  ;;  %v311_v4 = vmul.f32 %v307_v50, %v290_v35 }
  0xa6   : > { %638 = vtanh.f32 %v364_v2  ;;  %v318_v12 = vadd.f32 %v311_v4, %v272_v7 }
  0xa7   : > { %v342_v36 = vpop.permute.xlu0 %341 }
  0xa8   : > { %v337_v37 = vpop.permute.xlu1 %336  ;;  %v366_v5 = vadd.f32 %v342_v36, %v317_v63 }
  0xa9   : > { %v365_v6 = vadd.f32 %v337_v37, %v316_v61 }
  0xaa   : > { %640 = vtanh.f32 %v366_v5 }
  0xab   : > { %v347_v40 = vpop.permute.xlu0 %346  ;;  %642 = vtanh.f32 %v365_v6 }
  0xac   : > { %v367_v15 = vadd.f32 %v347_v40, %v318_v12 }
  0xad   : > { %v294_v41 = vpop.permute.xlu1 %293 }
  0xae   : > { %v312_v3 = vmul.f32 %v307_v50, %v294_v41  ;;  %644 = vtanh.f32 %v367_v15 }
  0xaf   : > { %v352_v46 = vpop.permute.xlu0 %351 }
  0xb0   : > { %v319_v10 = vadd.f32 %v312_v3, %v273_v1  ;;  %v639_v25 = vpop.eup %638 }
  0xb1   : > { %v298_v44 = vpop.permute.xlu1 %297 }
  0xb2   : > { %v313_v14 = vmul.f32 %v307_v50, %v298_v44  ;;  %v368_v18 = vadd.f32 %v352_v46, %v319_v10 }
  0xb3   : > { %v362_v52 = vpop.permute.xlu0 %361 }
  0xb4   : > { %v320_v20 = vadd.f32 %v313_v14, %v274_v17  ;;  %646 = vtanh.f32 %v368_v18  ;;  %v641_v26 = vpop.eup %640 }
  0xb5   : > { %v302_v49 = vpop.permute.xlu1 %301  ;;  %v643_v29 = vpop.eup %642 }
  0xb6   : > { %v314_v8 = vmul.f32 %v307_v50, %v302_v49 }
  0xb7   : > { %v393_v0 = vpop.permute.xlu0 %392 }
  0xb8   : > { %v321_v16 = vadd.f32 %v314_v8, %v275_v11  ;;  %v421_v30 = vmul.f32 %v643_v29, %v393_v0  ;;  %v645_v34 = vpop.eup %644 }
  0xba   : > { %v357_v57 = vpop.permute.xlu1 %356  ;;  %v370_v21 = vadd.f32 %v362_v52, %v321_v16 }
  0xbb   : > { %v403_v13 = vpop.permute.xlu0 %402  ;;  %v369_v23 = vadd.f32 %v357_v57, %v320_v20 }
  0xbc   : > { %648 = vtanh.f32 %v370_v21  ;;  %v423_v38 = vmul.f32 %v645_v34, %v403_v13 }
  0xbd   : > { %650 = vtanh.f32 %v369_v23 }
  0xbe   : > { %v388_v62 = vpop.permute.xlu1 %387  ;;  %v647_v36 = vpop.eup %646 }
  0xbf   : > { %v420_v27 = vmul.f32 %v639_v25, %v388_v62 }
  0xc0   : > { %v447_v22 = vpop.permute.xlu0 %446 }
  0xc1   : > { %v427_v28 = vadd.f32 %v421_v30, %v420_v27  ;;  %v470_v43 = vmul.f32 %v643_v29, %v447_v22 }
  0xc3   : > { %v443_v9 = vpop.permute.xlu1 %442 }
  0xc4   : > { %v459_v31 = vpop.permute.xlu0 %458  ;;  %v469_v39 = vmul.f32 %v639_v25, %v443_v9 }
  0xc5   : > { %v473_v59 = vmul.f32 %v647_v36, %v459_v31 }
  0xc6   : > { %v649_v42 = vpop.eup %648  ;;  %v476_v49 = vadd.f32 %v470_v43, %v469_v39 }
  0xc7   : > { %v651_v46 = vpop.eup %650 }
  0xc8   : > { %v398_v19 = vpop.permute.xlu1 %397 }
  0xc9   : > { %v422_v32 = vmul.f32 %v641_v26, %v398_v19  ;;  %v418_v40 = vpop.permute.xlu0 %417 }
  0xca   : > { %v426_v47 = vmul.f32 %v649_v42, %v418_v40 }
  0xcb   : > { %v428_v35 = vadd.f32 %v427_v28, %v422_v32 }
  0xcc   : > { %v433_v55 = vsel %vm432_vm0, %v426_v47, 0.0 }
  0xcd   : > { %v451_v24 = vpop.permute.xlu1 %450  ;;  %v429_v45 = vadd.f32 %v428_v35, %v423_v38 }
  0xce   : > { %v471_v44 = vmul.f32 %v641_v26, %v451_v24 }
  0xd0   : > { %v477_v53 = vadd.f32 %v476_v49, %v471_v44 }
  0xd1   : > { %v455_v33 = vpop.permute.xlu1 %454 }
  0xd2   : > { %v472_v50 = vmul.f32 %v645_v34, %v455_v33 }
  0xd4   : > { %v478_v56 = vadd.f32 %v477_v53, %v472_v50 }
  0xd6   : > { %v408_v37 = vpop.permute.xlu1 %407  ;;  %v479_v63 = vadd.f32 %v478_v56, %v473_v59 }
  0xd7   : > { %v424_v41 = vmul.f32 %v647_v36, %v408_v37 }
  0xd9   : > { %v430_v51 = vadd.f32 %v429_v45, %v424_v41 }
  0xda   : > { %v413_v48 = vpop.permute.xlu1 %412 }
  0xdb   : > { %v425_v52 = vmul.f32 %v651_v46, %v413_v48 }
  0xdd   : > { %v431_v54 = vadd.f32 %v430_v51, %v425_v52 }
  0xdf   : > { %v434_v57 = vadd.f32 %v433_v55, %v431_v54  ;;  %v463_v58 = vpop.permute.xlu1 %462 }
  0xe0   : > { %v474_v61 = vmul.f32 %v651_v46, %v463_v58 }
  0xe1   : > { %v435_v60 = vrot.slane %v434_v57, 4 }
  0xe2   : > { %v480_v2 = vadd.f32 %v479_v63, %v474_v61 }
  0xe3   : > { %v436_v62 = vadd.f32 %v435_v60, %v434_v57  ;;  %v467_v0 = vpop.permute.xlu1 %466 }
  0xe4   : > { %v475_v1 = vmul.f32 %v649_v42, %v467_v0 }
  0xe5   : > { %v437_v4 = vrot.slane %v436_v62, 2 }
  0xe6   : > { %v481_v3 = vsel %vm432_vm0, %v475_v1, 0.0 }
  0xe7   : > { %v482_v5 = vadd.f32 %v481_v3, %v480_v2  ;;  %v438_v8 = vadd.f32 %v437_v4, %v436_v62 }
  0xe8   : > { %v495_v13 = vpop.permute.xlu1 %494 }
  0xe9   : > { %v483_v6 = vrot.slane %v482_v5, 4  ;;  %v439_v11 = vrot.slane %v438_v8, 1 }
  0xeb   : > { %v484_v7 = vadd.f32 %v483_v6, %v482_v5  ;;  %v440_v14 = vadd.f32 %v439_v11, %v438_v8 }
  0xed   : > { %v485_v9 = vrot.slane %v484_v7, 2 }
  0xef   : > { %v486_v10 = vadd.f32 %v485_v9, %v484_v7 }
  0xf1   : > { %v487_v12 = vrot.slane %v486_v10, 1 }
  0xf3   : > { %v488_v15 = vadd.f32 %v487_v12, %v486_v10 }
  0xf5   : > { %v490_v16 = vsel %vm489_vm1, %v440_v14, %v488_v15 }
  0xf6   : > { %v497_v17 = vadd.f32 %v495_v13, %v490_v16 }
  0xf8   : > { %498 = vst [vmem:[%s215_s9] sm:$0x3] %v497_v17 }
  0xf9   : > { %665 = shalt.err (!%p662_p3)
}
  0xfa   : > { %s666_s23 = scalar_lea.hbm %s890_s13, 32  ;;  %s670_s30 = scalar_lea.hbm %s937_s5, 64 }
  0xfb   : > { %p667_p4 = scmp.ne.s32.totalorder %s890_s13, %s666_s23  ;;  %p671_p9 = scmp.lt.u32.totalorder %s890_s13, %s937_s5 }
  0xfc   : > { %p672_p10 = scmp.lt.u32.totalorder %s670_s30, %s666_s23  ;;  %p674_p12 = scmp.lt.u32.totalorder %s666_s23, %s890_s13 }
  0xfd   : > { %p668_p7 = pnand %p667_p4, %p787_p5 }
  0xfe   : > { %p673_p11 = por %p672_p10, %p671_p9 }
  0xff   : > { %p669_p8 = pneg %p668_p7 }
 0x100   : > { %p675_p13 = por %p674_p12, %p673_p11 }
 0x102   : > { %p676_p0 = pnand %p675_p13, %p669_p8 }
 0x104   : > { %679 = shalt.err (!%p676_p0)
}
 0x105   : > { %582 = dma.vmem_to_hbm [thread:$0]  (%p787_p5), %s892_s10, 32, %s890_s13, %s500_s14  }
 0x106 PF: > { %p588_p1 = scmp.ge.s32.totalorder %s714_s21, 2  ;;  %s525_s8 = sand.u32 1, %s702_s18  }
 0x107   : > { %s526_s9 = scalar_lea.sflag [#allocation3], %s525_s8 }
 0x108   : > { %p585_p2 = pnand %p588_p1, %p791_p6 }
 0x10a   : > { %697 = dma.done.wait (!%p585_p2), %s526_s9, 32  }
 0x10b   : > { %699 = vsyncadd (!%p585_p2), %s526_s9, 4294967264  ;;  %p15_p3 = scmp.ge.s32.totalorder %s774_s24, 4   ;;  %s940_s18 = smov %s706_s19 }
 0x10c   : > { %s941_s19 = smov %s710_s20  ;;  %s942_s20 = smov %s785_s27 }
 0x10d   : > { %s943_s21 = smov %s774_s24  ;;  %17 = sbr.rel (!%p15_p3) target bundleno = 3 (0x3), region = 75 }
 0x114   :  { %531 = vsyncpa [#allocation3], 1 }
 0x115   :  { %533 = vsyncpa [#allocation3 + $0x1], 1 }

</bundles_post_ra>
